<compile_context>
chip_gen: v7x
topology: tpu7x:2x2x1
jax: 0.10.0
libtpu: 0.0.40
codegen_flags: <defaults>
</compile_context>

<pallas_src>
import jax
import jax.numpy as jnp
from jax.experimental import pallas as pl
from jax.experimental.pallas import tpu as pltpu


IN_FEATURES = 10
OUT_FEATURES = 5
OUT_PAD8 = 8          # pad OUT only to the sublane granularity (5 -> 8)
DEFAULT_BLOCK_B = 2048  # batch tile (lane axis); multiple of 128


def linear_t_kernel(w_ref, b_ref, x_ref, o_ref):
    # w_ref: (OUT_PAD8, IN)   -- resident across the grid
    # b_ref: (OUT_PAD8, 1)    -- resident across the grid
    # x_ref: (IN, tb)         -- batch tile, batch on lanes
    # o_ref: (OUT_PAD8, tb)
    acc = jnp.dot(w_ref[...], x_ref[...], preferred_element_type=jnp.float32)
    o_ref[...] = (acc + b_ref[...]).astype(o_ref.dtype)


def prepare_params(weight, bias, out_pad=OUT_PAD8):
    """One-time param prep: zero-pad OUT 5 -> 8 (sublane granularity).

    weight: (out_features, in_features) -> w_pad: (out_pad, in_features)
    bias:   (out_features,)             -> b_pad: (out_pad, 1)
    Padded rows are zero, so rows [out_features:] of the kernel output are
    exactly zero and slicing them off is exact.
    """
    out_f, in_f = weight.shape
    w_pad = jnp.zeros((out_pad, in_f), weight.dtype).at[:out_f, :].set(weight)
    b_pad = jnp.zeros((out_pad, 1), bias.dtype).at[:out_f, 0].set(bias)
    return w_pad, b_pad


def linear_forward_t(x_t, w_pad, b_pad, *, block_b=DEFAULT_BLOCK_B):
    """Kernel-native (transposed) path: y^T = W_pad @ x^T + b.

    x_t: (in_features, B)  -- batch on the lane axis.
    Returns y_t_pad: (OUT_PAD8, B); rows [out_features:] are zero.
    """
    in_f, B = x_t.shape
    out_pad, in_f2 = w_pad.shape
    assert in_f == in_f2 and out_pad % 8 == 0

    if B <= block_b:
        # Single tile whose block equals the full array extent: the (8, 128)
        # divisibility constraint does not apply, so no padding of B needed.
        tb = B
    else:
        assert block_b % 128 == 0
        tb = block_b  # tail tile (if any) is masked by Pallas; no jnp.pad.

    grid = (pl.cdiv(B, tb),)

    return pl.pallas_call(
        linear_t_kernel,
        out_shape=jax.ShapeDtypeStruct((out_pad, B), x_t.dtype),
        grid=grid,
        in_specs=[
            pl.BlockSpec((out_pad, in_f), lambda i: (0, 0)),  # W (resident)
            pl.BlockSpec((out_pad, 1), lambda i: (0, 0)),     # b (resident)
            pl.BlockSpec((in_f, tb), lambda i: (0, i)),       # x^T batch tile
        ],
        out_specs=pl.BlockSpec((out_pad, tb), lambda i: (0, i)),
        compiler_params=pltpu.CompilerParams(
            # Shards the batch grid across both TensorCores on v7x when the
            # grid has >= 2 steps; harmless no-op otherwise.
            dimension_semantics=("parallel",),
        ),
    )(w_pad, b_pad, x_t)


def net_forward(x, w_pad, b_pad, out_features=OUT_FEATURES, *,
                min_pallas_batch=1024, block_b=DEFAULT_BLOCK_B):
    """PyTorch-facing forward: x (B, in_features) -> y (B, out_features).

    Tiny batches are pure dispatch overhead for a standalone kernel, so they
    go straight to plain JAX (XLA fuses a 10->5 matmul trivially).  Large
    batches use the Pallas batch-on-lanes kernel.  Callers that already hold
    activations in (in_features, B) layout should call linear_forward_t
    directly and skip the transposes below (layout plumbing, not compute).
    """
    B = x.shape[0]
    if B < min_pallas_batch:
        return x @ w_pad[:out_features, :].T + b_pad[:out_features, 0]
    y_t = linear_forward_t(x.T, w_pad, b_pad, block_b=block_b)
    return y_t[:out_features, :].T


if __name__ == "__main__":
    key = jax.random.PRNGKey(0)
    k_x, k_w, k_b = jax.random.split(key, 3)

    B, IN, OUT = 8, IN_FEATURES, OUT_FEATURES

    # Deterministic PyTorch-style init: uniform(-1/sqrt(IN), 1/sqrt(IN)).
    bound = 1.0 / jnp.sqrt(jnp.float32(IN))
    weight = jax.random.uniform(k_w, (OUT, IN), jnp.float32, -bound, bound)
    bias = jax.random.uniform(k_b, (OUT,), jnp.float32, -bound, bound)

    x = jax.random.normal(k_x, (B, IN), jnp.float32)

    # Parameter prep happens once (zero-pad OUT 5 -> 8), not per call.
    w_pad, b_pad = prepare_params(weight, bias)

    # Force the Pallas path for the demo (min_pallas_batch=0); production
    # default routes a batch this small to the plain-JAX fast path above.
    y = net_forward(x, w_pad, b_pad, OUT, min_pallas_batch=0)
    jax.block_until_ready(y)

    # Reference check against plain JAX (nn.Linear semantics).
    y_ref = x @ weight.T + bias
    assert y.shape == (B, OUT)
    assert jnp.allclose(y, y_ref, atol=1e-5, rtol=1e-5), "mismatch vs reference"

    print("KERNEL_OK")
</pallas_src>

<mosaic_0001>
module attributes {stable_mosaic.version = 11 : i64} {
  func.func @linear_t_kernel(%arg0: i32, %arg1: memref<8x10xf32, #tpu.memory_space<vmem>>, %arg2: memref<8x1xf32, #tpu.memory_space<vmem>>, %arg3: memref<10x8xf32, #tpu.memory_space<vmem>>, %arg4: memref<8x8xf32, #tpu.memory_space<vmem>>) attributes {dimension_semantics = [#tpu.dimension_semantics<parallel>], iteration_bounds = array<i64: 1>, scalar_prefetch = 0 : i64, scratch_operands = 0 : i64, tpu.core_type = #tpu.core_type<tc>, window_params = [{pipeline_mode = #tpu.pipeline_mode<synchronous>, transform_indices = @transform_0, window_bounds = array<i64: 8, 10>}, {pipeline_mode = #tpu.pipeline_mode<synchronous>, transform_indices = @transform_1, window_bounds = array<i64: 8, 1>}, {transform_indices = @transform_2, window_bounds = array<i64: 10, 8>}, {transform_indices = @transform_3, window_bounds = array<i64: 8, 8>}]} {
    %c0 = arith.constant 0 : index
    %c0_0 = arith.constant 0 : index
    %0 = vector.load %arg1[%c0, %c0_0] : memref<8x10xf32, #tpu.memory_space<vmem>>, vector<8x10xf32>
    %c0_1 = arith.constant 0 : index
    %c0_2 = arith.constant 0 : index
    %1 = vector.load %arg3[%c0_1, %c0_2] : memref<10x8xf32, #tpu.memory_space<vmem>>, vector<10x8xf32>
    %cst = arith.constant dense<0.000000e+00> : vector<8x8xf32>
    %2 = tpu.matmul %0, %1, %cst {dimension_numbers = #tpu.dot_dimension_numbers<[1], [0], [0], [1], [0, 0, 1, 1], [], []>} : vector<8x10xf32>, vector<10x8xf32>, vector<8x8xf32> -> vector<8x8xf32>
    %c0_3 = arith.constant 0 : index
    %c0_4 = arith.constant 0 : index
    %3 = vector.load %arg2[%c0_3, %c0_4] : memref<8x1xf32, #tpu.memory_space<vmem>>, vector<8x1xf32>
    %4 = vector.broadcast %3 : vector<8x1xf32> to vector<8x8xf32>
    %5 = arith.addf %2, %4 : vector<8x8xf32>
    %c0_5 = arith.constant 0 : index
    %c0_6 = arith.constant 0 : index
    %6 = vector.load %arg4[%c0_5, %c0_6] : memref<8x8xf32, #tpu.memory_space<vmem>>, vector<8x8xf32>
    tpu.vector_store %arg4[%c0_5, %c0_6], %5 {strides = array<i32>} : memref<8x8xf32, #tpu.memory_space<vmem>>, vector<8x8xf32>,
    return
  }
  func.func @transform_0(%arg0: i32) -> (i32, i32) {
    %c0_i32 = arith.constant 0 : i32
    %c0_i32_0 = arith.constant 0 : i32
    %c0_i32_1 = arith.constant 0 : i32
    return %c0_i32, %c0_i32_0 : i32, i32
  }
  func.func @transform_1(%arg0: i32) -> (i32, i32) {
    %c0_i32 = arith.constant 0 : i32
    %c0_i32_0 = arith.constant 0 : i32
    %c0_i32_1 = arith.constant 0 : i32
    return %c0_i32, %c0_i32_0 : i32, i32
  }
  func.func @transform_2(%arg0: i32) -> (i32, i32) {
    %c0_i32 = arith.constant 0 : i32
    %c0_i32_0 = arith.constant 0 : i32
    return %c0_i32, %arg0 : i32, i32
  }
  func.func @transform_3(%arg0: i32) -> (i32, i32) {
    %c0_i32 = arith.constant 0 : i32
    %c0_i32_0 = arith.constant 0 : i32
    return %c0_i32, %arg0 : i32, i32
  }
}

</mosaic_0001>

<bundles_post_ra>
// kernel: tpu_custom_call.1
= control target key start
LH: loop header
LB: loop body
LE: loop exit
PB: predicated region body
PF: predicated region fallthrough
CT: control target
= control target key end

     0   :  { %vm28_vm0 = vcmask 1041408   ;;  %v165_v2 = vmov 0.0|0.0   ;;  %vm166_vm1 = vmmov 1   ;;  %vm167_vm3 = vmmov 0   ;;  %s215_s0 = inlined_call_operand.vmem [shape: f32[8,10], index: 0, kind: input, shape index: {}]   ;;  %s216_s1 = inlined_call_operand.vmem [shape: f32[8,1], index: 1, kind: input, shape index: {}]   ;;  %s217_s2 = inlined_call_operand.vmem [shape: f32[10,8], index: 2, kind: input, shape index: {}]   ;;  %s218_s3 = inlined_call_operand.hbm [shape: f32[8,8], index: 3, kind: output, shape index: {}]  }
   0x1   :  { %v16_v0 = vld [vmem:[%s217_s2] sm:$0xff]  ;;  %v17_v1 = vld [vmem:[%s217_s2 + $0x8] sm:$0x3]  ;;  %130 = vmatprep.subr.bf16.mxu0 %v165_v2  ;;  %vm132_vm2 = vmpackc.low %vm28_vm0, %vm166_vm1  ;;  %v168_v5 = vmov 0.0  }
   0x2   :  { %v131_v3 = vpack.c.bf16 %v17_v1, %v16_v0  ;;  %v18_v4 = vld [vmem:[%s216_s1] sm:$0xff]  ;;  %127 = vmatprep.mubr.msk.f32.mxu0 %vm167_vm3, %v168_v5 }
   0x3   :  { %8 = vsyncpa [#allocation3], 0  ;;  %v15_v6 = vld [vmem:[%s215_s0] sm:$0xff]  ;;  %vm24_vm4 = vcmask 80896   ;;  %v169_v7 = vmov 0   ;;  %s170_s2 = smov [#allocation2]  }
   0x4   :  { %133 = vmatpush3.bf16.msk.msra.mxu0 %vm132_vm2, %v131_v3  ;;  %140 = vset.pattern.permute.xlu0 %v169_v7  ;;  %s110_s20 = sshll.u32 %s170_s2, 4  ;;  %vm102_vm5 = vcmask 64512   ;;  %s111_s20 = int_to_ptr.vmem [resolvable:$true] %s110_s20 }
   0x5   :  { %21 = vperm.xlu0 %140, %v18_v4   ;;  %s141_s1 = scalar_lea.vmem %s111_s20, 128  ;;  %p146_p1 = scmp.lt.s32.totalorder %s111_s20, %s111_s20 }
   0x6   :  { %p142_p0 = scmp.ne.s32.totalorder %s111_s20, %s141_s1  ;;  %p147_p2 = scmp.lt.s32.totalorder %s141_s1, %s141_s1 }
   0x7   :  { %128 = vmatmul.mubr.msk.f32.vlgmr.msra.gmra.mrb[0].mxu0 %vm24_vm4, %v15_v6 }
   0x8   :  { %p148_p3 = por %p147_p2, %p146_p1 }
   0xa   :  { %p149_p4 = pnand %p148_p3, %p142_p0 }
  0x84   :  { %v22_v8 = vpop.permute.xlu0 %21 }
  0xda   :  { %v98_v9 = vpop.f32.mrb[0].mxu0 }
  0xdb   :  { %v99_v10 = vadd.f32 %v98_v9, %v22_v8  ;;  %v129_v11 = vpop.f32.mrb[1].mxu0 }
  0xdd   :  { %103 = vst.msk [vmem:[#allocation2] sm:$0xff] %vm102_vm5, %v99_v10 }
  0xde   :  { %152 = shalt.err (!%p149_p4)
}
  0xdf   :  { %s153_s22 = scalar_lea.hbm %s218_s3, 128 }
  0xe0   :  { %p154_p5 = scmp.ne.s32.totalorder %s218_s3, %s153_s22  ;;  %p157_p6 = scmp.lt.u32.totalorder %s153_s22, %s218_s3 }
  0xe2   :  { %p159_p7 = pnand %p157_p6, %p154_p5 }
  0xe4   :  { %162 = shalt.err (!%p159_p7)
}
  0xe5   :  { %113 = dma.vmem_to_hbm [thread:$0]  %s111_s20, 128, %s218_s3, [#allocation3]  }
  0xe6   :  { %163 = dma.done.wait [#allocation3], 128  }
  0xe7   :  { %164 = vsyncadd [#allocation3], 4294967168 }
  0xe8   :  { %117 = vsyncpa [#allocation3], 1 }

</bundles_post_ra>
